<compile_context>
chip_gen: v6e
topology: v6e:2x2x1
jax: 0.10.0
libtpu: 0.0.40
codegen_flags: <defaults>
</compile_context>

<pallas_src>
import functools

import jax
import jax.numpy as jnp
from jax.experimental import pallas as pl
from jax.experimental.pallas import tpu as pltpu


def _vq_kernel(z_ref, emb_aug_ref, embt_ref, q_ref, idx_ref, sse_ref,
               *, batch, channels, chunk):
    # z_ref / q_ref: (B*C, tile_m) lane-dense; idx_ref: (B, tile_m);
    # emb_aug_ref: (K, C+1) = [-2*E | ||e||^2]; embt_ref: (C, K); sse_ref: (1,1,128)
    emb_aug = emb_aug_ref[...].astype(jnp.float32)     # (K, C+1), resident
    emb_t = embt_ref[...].astype(jnp.float32)          # (C, K),   resident
    num_codes = emb_aug.shape[0]
    tile_m = z_ref.shape[-1]
    n_chunks = tile_m // chunk

    ones_row = jnp.ones((1, chunk), jnp.float32)       # hoisted out of the loop

    def chunk_body(c, sse):
        off = pl.multiple_of(c * chunk, chunk)
        for b in range(batch):                         # static, small
            r0 = b * channels
            z_b = z_ref[r0:r0 + channels, pl.ds(off, chunk)].astype(jnp.float32)  # (C, chunk)

            # dists(k, m) = ||e_k||^2 - 2 e_k . z_m   (per-column ||z||^2 dropped:
            # constant per column, argmin unchanged) — one MXU contraction.
            z_aug = jnp.concatenate([z_b, ones_row], axis=0)                      # (C+1, chunk)
            dists = jnp.dot(emb_aug, z_aug, preferred_element_type=jnp.float32)   # (K, chunk)

            # first-occurrence argmin over K (torch tie-breaking); masked iota is
            # reused for the one-hot so dists/k_iota can die early.
            min_d = jnp.min(dists, axis=0, keepdims=True)                         # (1, chunk)
            k_iota = jax.lax.broadcasted_iota(jnp.int32, dists.shape, 0)          # (K, chunk)
            masked = jnp.where(dists == min_d, k_iota, jnp.int32(num_codes))      # (K, chunk)
            idx = jnp.min(masked, axis=0)                                         # (chunk,)
            one_hot = (masked == idx[None, :]).astype(jnp.float32)                # (K, chunk)

            quant = jnp.dot(emb_t, one_hot, preferred_element_type=jnp.float32)   # (C, chunk)

            q_ref[r0:r0 + channels, pl.ds(off, chunk)] = quant.astype(q_ref.dtype)
            idx_ref[b, pl.ds(off, chunk)] = idx

            diff = quant - z_b
            sse = sse + jnp.sum(diff * diff)
        return sse

    sse = jax.lax.fori_loop(0, n_chunks, chunk_body, jnp.zeros((), jnp.float32))
    sse_ref[...] = jnp.zeros_like(sse_ref) + sse       # per-tile partial SSE


def _pick_tiles(M, K, target_lanes=2048):
    """Pick (tile_m, chunk): tile_m a lane-multiple divisor of M near target
    (preferring an even grid count so a v7x chip feeds both TensorCores);
    chunk keeps the (K, chunk) working set ~vreg-resident."""
    if M % 128 != 0:
        # TODO(synk): ragged-tail handling; single full-width block fallback.
        return M, M
    divisors = [t for t in range(128, M + 1, 128) if M % t == 0]
    even = [t for t in divisors if t <= target_lanes and (M // t) % 2 == 0]
    small = [t for t in divisors if t <= target_lanes]
    if even:
        tile_m = max(even)
    elif small:
        tile_m = max(small)
    else:
        tile_m = min(divisors)
    chunk = max(128, min(tile_m, (32768 // max(K, 1)) // 128 * 128))
    while tile_m % chunk != 0:
        chunk -= 128
    return tile_m, chunk


@functools.partial(jax.jit, static_argnames=("tile_m", "chunk"))
def ema_quantizer_forward(z_e, embedding, tile_m=None, chunk=None):
    """z_e: (B, C, D, H, W); embedding: (K, C)."""
    B, C, D, H, W = z_e.shape
    K = embedding.shape[0]
    M = D * H * W
    rows = B * C

    if tile_m is None or chunk is None:
        auto_tile, auto_chunk = _pick_tiles(M, K)
        tile_m = auto_tile if tile_m is None else tile_m
        chunk = auto_chunk if chunk is None else chunk
    assert M % tile_m == 0, "D*H*W must be a multiple of tile_m"
    assert tile_m % chunk == 0, "tile_m must be a multiple of chunk"
    grid_m = M // tile_m

    # TODO(synk): verify in HLO that this reshape does not insert a relayout
    # copy for production shapes; if it does, consume the native 5-D layout
    # via BlockSpec (block (1, C, d_tile, H, W)) when H*W is lane-friendly.
    z2 = z_e.reshape(rows, M)

    emb_f32 = embedding.astype(jnp.float32)
    e_sq = jnp.sum(emb_f32 * emb_f32, axis=1, keepdims=True)      # (K, 1), tiny
    emb_aug = jnp.concatenate([-2.0 * emb_f32, e_sq], axis=1)     # (K, C+1), tiny
    emb_t = emb_f32.T                                             # (C, K), tiny

    # K/VMEM-aware scoped-VMEM limit (double-buffered blocks + chunk temporaries),
    # kept well under v7x's 64 MiB physical VMEM.
    itemsize = jnp.dtype(z_e.dtype).itemsize
    rows_pad = -(-rows // 8) * 8
    idx_rows_pad = -(-B // 8) * 8
    block_bytes = 2 * tile_m * (2 * rows_pad * itemsize + idx_rows_pad * 4)
    inter_bytes = chunk * 4 * (6 * K + 4 * rows_pad)
    vmem_limit = int(min(48 << 20, max(16 << 20, 2 * (block_bytes + inter_bytes))))

    quant2, idx2, sse_parts = pl.pallas_call(
        functools.partial(_vq_kernel, batch=B, channels=C, chunk=chunk),
        out_shape=(
            jax.ShapeDtypeStruct((rows, M), z_e.dtype),            # quantized, (B*C, M)
            jax.ShapeDtypeStruct((B, M), jnp.int32),               # encoding indices
            jax.ShapeDtypeStruct((grid_m, 1, 128), jnp.float32),   # per-tile SSE partials
        ),
        grid_spec=pltpu.PrefetchScalarGridSpec(
            num_scalar_prefetch=0,
            grid=(grid_m,),
            in_specs=[
                pl.BlockSpec((rows, tile_m), lambda m: (0, m)),    # z slab (full sublanes)
                pl.BlockSpec((K, C + 1), lambda m: (0, 0)),        # [-2E | e^2] (resident)
                pl.BlockSpec((C, K), lambda m: (0, 0)),            # E^T (resident)
            ],
            out_specs=[
                pl.BlockSpec((rows, tile_m), lambda m: (0, m)),
                pl.BlockSpec((B, tile_m), lambda m: (0, m)),
                pl.BlockSpec((1, 1, 128), lambda m: (m, 0, 0)),
            ],
        ),
        compiler_params=pltpu.CompilerParams(
            dimension_semantics=("parallel",),
            vmem_limit_bytes=vmem_limit,
        ),
    )(z2, emb_aug, emb_t)

    mse = jnp.sum(sse_parts[:, 0, 0]) / jnp.float32(rows * M)
    losses = {"codebook_loss": mse, "commitment_loss": mse}

    quantized = quant2.reshape(B, C, D, H, W)   # straight-through value == quantized
    indices_view = idx2.reshape(B, D, H, W)
    return quantized, losses, indices_view


def _reference(z_e, embedding):
    B, C, D, H, W = z_e.shape
    z_flat = jnp.transpose(z_e, (0, 2, 3, 4, 1)).reshape(-1, C)
    dists = (
        jnp.sum(z_flat**2, axis=1, keepdims=True)
        - 2.0 * z_flat @ embedding.T
        + jnp.sum(embedding**2, axis=1)
    )
    idx = jnp.argmin(dists, axis=1)
    quant_flat = embedding[idx]
    quant = jnp.transpose(quant_flat.reshape(B, D, H, W, C), (0, 4, 1, 2, 3))
    mse = jnp.mean((quant - z_e) ** 2)
    return quant, mse, idx.reshape(B, D, H, W)


if __name__ == "__main__":
    # module config (synthetic, deterministic init — no checkpoint load)
    embedding_dim = 4        # C
    num_embeddings = 64      # K
    B, D, H, W = 2, 4, 8, 8  # M = 256 per batch, B*C = 8 (no sublane padding)

    key = jax.random.PRNGKey(0)
    k_z, k_emb = jax.random.split(key)
    z_e = jax.random.normal(k_z, (B, embedding_dim, D, H, W), dtype=jnp.float32)
    embedding = jax.random.normal(k_emb, (num_embeddings, embedding_dim), dtype=jnp.float32)

    quantized, losses, enc_idx = ema_quantizer_forward(z_e, embedding)
    jax.block_until_ready((quantized, losses, enc_idx))

    # sanity check against pure-JAX reference (torch semantics)
    ref_q, ref_mse, ref_idx = _reference(z_e, embedding)
    assert jnp.allclose(quantized, ref_q, atol=1e-5), "quantized mismatch"
    assert jnp.allclose(losses["commitment_loss"], ref_mse, atol=1e-5), "loss mismatch"
    assert jnp.allclose(losses["codebook_loss"], ref_mse, atol=1e-5), "loss mismatch"
    assert jnp.array_equal(enc_idx, ref_idx.astype(jnp.int32)), "indices mismatch"
    assert not (jnp.isnan(quantized).any() or jnp.isinf(quantized).any()), "NaN/Inf in quantized"

    print("KERNEL_OK")
</pallas_src>

<mosaic_0001>
module attributes {stable_mosaic.version = 11 : i64} {
  func.func @_vq_kernel(%arg0: i32, %arg1: memref<8x128xf32, #tpu.memory_space<vmem>>, %arg2: memref<64x5xf32, #tpu.memory_space<vmem>>, %arg3: memref<4x64xf32, #tpu.memory_space<vmem>>, %arg4: memref<8x128xf32, #tpu.memory_space<vmem>>, %arg5: memref<2x128xi32, #tpu.memory_space<vmem>>, %arg6: memref<1x1x128xf32, #tpu.memory_space<vmem>>) attributes {dimension_semantics = [#tpu.dimension_semantics<parallel>], iteration_bounds = array<i64: 2>, scalar_prefetch = 0 : i64, scratch_operands = 0 : i64, tpu.core_type = #tpu.core_type<tc>, window_params = [{transform_indices = @transform_0, window_bounds = array<i64: 8, 128>}, {pipeline_mode = #tpu.pipeline_mode<synchronous>, transform_indices = @transform_1, window_bounds = array<i64: 64, 5>}, {pipeline_mode = #tpu.pipeline_mode<synchronous>, transform_indices = @transform_2, window_bounds = array<i64: 4, 64>}, {transform_indices = @transform_3, window_bounds = array<i64: 8, 128>}, {transform_indices = @transform_4, window_bounds = array<i64: 2, 128>}, {transform_indices = @transform_5, window_bounds = array<i64: 1, 1, 128>}]} {
    %c0 = arith.constant 0 : index
    %c0_0 = arith.constant 0 : index
    %0 = vector.load %arg2[%c0, %c0_0] : memref<64x5xf32, #tpu.memory_space<vmem>>, vector<64x5xf32>
    %c0_1 = arith.constant 0 : index
    %c0_2 = arith.constant 0 : index
    %1 = vector.load %arg3[%c0_1, %c0_2] : memref<4x64xf32, #tpu.memory_space<vmem>>, vector<4x64xf32>
    %cst = arith.constant 1.000000e+00 : f32
    %2 = vector.broadcast %cst : f32 to vector<1x128xf32>
    %cst_3 = arith.constant 0.000000e+00 : f32
    %c0_i32 = arith.constant 0 : i32
    %c128_i32 = arith.constant 128 : i32
    %3 = arith.muli %c0_i32, %c128_i32 : i32
    %4 = tpu.assume_multiple %3, 128 : i32
    %c0_4 = arith.constant 0 : index
    %5 = arith.index_cast %4 : i32 to index
    %6 = vector.load %arg1[%c0_4, %5] : memref<8x128xf32, #tpu.memory_space<vmem>>, vector<4x128xf32>
    %7 = tpu.concatenate %6, %2 in 0 : vector<4x128xf32>, vector<1x128xf32> -> vector<5x128xf32>
    %cst_5 = arith.constant dense<0.000000e+00> : vector<64x128xf32>
    %8 = tpu.matmul %0, %7, %cst_5 {dimension_numbers = #tpu.dot_dimension_numbers<[1], [0], [0], [1], [0, 0, 1, 1], [], []>} : vector<64x5xf32>, vector<5x128xf32>, vector<64x128xf32> -> vector<64x128xf32>
    %cst_6 = arith.constant dense<0x7F800000> : vector<128xf32>
    %9 = vector.multi_reduction <minimumf>, %8, %cst_6 [0] : vector<64x128xf32> to vector<128xf32>
    %10 = vector.shape_cast %9 : vector<128xf32> to vector<1x128xf32>
    %11 = tpu.iota {dimensions = array<i32: 0>} : vector<64x128xi32>
    %12 = vector.broadcast %10 : vector<1x128xf32> to vector<64x128xf32>
    %13 = arith.cmpf oeq, %8, %12 : vector<64x128xf32>
    %c64_i32 = arith.constant 64 : i32
    %14 = vector.broadcast %c64_i32 : i32 to vector<64x128xi32>
    %15 = arith.select %13, %11, %14 : vector<64x128xi1>, vector<64x128xi32>
    %cst_7 = arith.constant dense<2147483647> : vector<128xi32>
    %16 = vector.multi_reduction <minsi>, %15, %cst_7 [0] : vector<64x128xi32> to vector<128xi32>
    %17 = vector.shape_cast %16 : vector<128xi32> to vector<1x128xi32>
    %18 = vector.broadcast %17 : vector<1x128xi32> to vector<64x128xi32>
    %19 = arith.cmpi eq, %15, %18 : vector<64x128xi32>
    %20 = arith.extui %19 : vector<64x128xi1> to vector<64x128xi32>
    %21 = arith.sitofp %20 : vector<64x128xi32> to vector<64x128xf32>
    %cst_8 = arith.constant dense<0.000000e+00> : vector<4x128xf32>
    %22 = tpu.matmul %1, %21, %cst_8 {dimension_numbers = #tpu.dot_dimension_numbers<[1], [0], [0], [1], [0, 0, 1, 1], [], []>} : vector<4x64xf32>, vector<64x128xf32>, vector<4x128xf32> -> vector<4x128xf32>
    %c0_9 = arith.constant 0 : index
    %23 = arith.index_cast %4 : i32 to index
    %24 = vector.load %arg4[%c0_9, %23] : memref<8x128xf32, #tpu.memory_space<vmem>>, vector<4x128xf32>
    tpu.vector_store %arg4[%c0_9, %23], %22 {strides = array<i32>} : memref<8x128xf32, #tpu.memory_space<vmem>>, vector<4x128xf32>,
    %c0_10 = arith.constant 0 : index
    %25 = arith.index_cast %4 : i32 to index
    %26 = vector.load %arg5[%c0_10, %25] : memref<2x128xi32, #tpu.memory_space<vmem>>, vector<1x128xi32>
    %27 = vector.shape_cast %26 : vector<1x128xi32> to vector<128xi32>
    %28 = vector.shape_cast %16 : vector<128xi32> to vector<1x128xi32>
    tpu.vector_store %arg5[%c0_10, %25], %28 {strides = array<i32>} : memref<2x128xi32, #tpu.memory_space<vmem>>, vector<1x128xi32>,
    %29 = arith.subf %22, %6 : vector<4x128xf32>
    %30 = arith.mulf %29, %29 : vector<4x128xf32>
    %31 = vector.shape_cast %30 : vector<4x128xf32> to vector<1x4x128xf32>
    %cst_11 = arith.constant dense<0.000000e+00> : vector<1xf32>
    %32 = vector.multi_reduction <add>, %31, %cst_11 [1, 2] : vector<1x4x128xf32> to vector<1xf32>
    %33 = vector.shape_cast %32 : vector<1xf32> to vector<1x1x1xf32>
    %34 = vector.extract %33[0, 0, 0] : f32 from vector<1x1x1xf32>
    %35 = arith.addf %cst_3, %34 : f32
    %c4 = arith.constant 4 : index
    %36 = arith.index_cast %4 : i32 to index
    %37 = vector.load %arg1[%c4, %36] : memref<8x128xf32, #tpu.memory_space<vmem>>, vector<4x128xf32>
    %38 = tpu.concatenate %37, %2 in 0 : vector<4x128xf32>, vector<1x128xf32> -> vector<5x128xf32>
    %cst_12 = arith.constant dense<0.000000e+00> : vector<64x128xf32>
    %39 = tpu.matmul %0, %38, %cst_12 {dimension_numbers = #tpu.dot_dimension_numbers<[1], [0], [0], [1], [0, 0, 1, 1], [], []>} : vector<64x5xf32>, vector<5x128xf32>, vector<64x128xf32> -> vector<64x128xf32>
    %cst_13 = arith.constant dense<0x7F800000> : vector<128xf32>
    %40 = vector.multi_reduction <minimumf>, %39, %cst_13 [0] : vector<64x128xf32> to vector<128xf32>
    %41 = vector.shape_cast %40 : vector<128xf32> to vector<1x128xf32>
    %42 = tpu.iota {dimensions = array<i32: 0>} : vector<64x128xi32>
    %43 = vector.broadcast %41 : vector<1x128xf32> to vector<64x128xf32>
    %44 = arith.cmpf oeq, %39, %43 : vector<64x128xf32>
    %c64_i32_14 = arith.constant 64 : i32
    %45 = vector.broadcast %c64_i32_14 : i32 to vector<64x128xi32>
    %46 = arith.select %44, %42, %45 : vector<64x128xi1>, vector<64x128xi32>
    %cst_15 = arith.constant dense<2147483647> : vector<128xi32>
    %47 = vector.multi_reduction <minsi>, %46, %cst_15 [0] : vector<64x128xi32> to vector<128xi32>
    %48 = vector.shape_cast %47 : vector<128xi32> to vector<1x128xi32>
    %49 = vector.broadcast %48 : vector<1x128xi32> to vector<64x128xi32>
    %50 = arith.cmpi eq, %46, %49 : vector<64x128xi32>
    %51 = arith.extui %50 : vector<64x128xi1> to vector<64x128xi32>
    %52 = arith.sitofp %51 : vector<64x128xi32> to vector<64x128xf32>
    %cst_16 = arith.constant dense<0.000000e+00> : vector<4x128xf32>
    %53 = tpu.matmul %1, %52, %cst_16 {dimension_numbers = #tpu.dot_dimension_numbers<[1], [0], [0], [1], [0, 0, 1, 1], [], []>} : vector<4x64xf32>, vector<64x128xf32>, vector<4x128xf32> -> vector<4x128xf32>
    %c4_17 = arith.constant 4 : index
    %54 = arith.index_cast %4 : i32 to index
    %55 = vector.load %arg4[%c4_17, %54] : memref<8x128xf32, #tpu.memory_space<vmem>>, vector<4x128xf32>
    tpu.vector_store %arg4[%c4_17, %54], %53 {strides = array<i32>} : memref<8x128xf32, #tpu.memory_space<vmem>>, vector<4x128xf32>,
    %c1 = arith.constant 1 : index
    %56 = arith.index_cast %4 : i32 to index
    %57 = vector.load %arg5[%c1, %56] : memref<2x128xi32, #tpu.memory_space<vmem>>, vector<1x128xi32>
    %58 = vector.shape_cast %57 : vector<1x128xi32> to vector<128xi32>
    %59 = vector.shape_cast %47 : vector<128xi32> to vector<1x128xi32>
    tpu.vector_store %arg5[%c1, %56], %59 {strides = array<i32>} : memref<2x128xi32, #tpu.memory_space<vmem>>, vector<1x128xi32>,
    %60 = arith.subf %53, %37 : vector<4x128xf32>
    %61 = arith.mulf %60, %60 : vector<4x128xf32>
    %62 = vector.shape_cast %61 : vector<4x128xf32> to vector<1x4x128xf32>
    %cst_18 = arith.constant dense<0.000000e+00> : vector<1xf32>
    %63 = vector.multi_reduction <add>, %62, %cst_18 [1, 2] : vector<1x4x128xf32> to vector<1xf32>
    %64 = vector.shape_cast %63 : vector<1xf32> to vector<1x1x1xf32>
    %65 = vector.extract %64[0, 0, 0] : f32 from vector<1x1x1xf32>
    %66 = arith.addf %35, %65 : f32
    %c1_i32 = arith.constant 1 : i32
    %cst_19 = arith.constant 0.000000e+00 : f32
    %67 = vector.broadcast %cst_19 : f32 to vector<1x1x128xf32>
    %68 = vector.broadcast %66 : f32 to vector<1x1x128xf32>
    %69 = arith.addf %67, %68 : vector<1x1x128xf32>
    %c0_20 = arith.constant 0 : index
    %c0_21 = arith.constant 0 : index
    %c0_22 = arith.constant 0 : index
    %70 = vector.load %arg6[%c0_20, %c0_21, %c0_22] : memref<1x1x128xf32, #tpu.memory_space<vmem>>, vector<1x1x128xf32>
    tpu.vector_store %arg6[%c0_20, %c0_21, %c0_22], %69 {strides = array<i32>} : memref<1x1x128xf32, #tpu.memory_space<vmem>>, vector<1x1x128xf32>,
    return
  }
  func.func @transform_0(%arg0: i32) -> (i32, i32) {
    %c0_i32 = arith.constant 0 : i32
    %c0_i32_0 = arith.constant 0 : i32
    return %c0_i32, %arg0 : i32, i32
  }
  func.func @transform_1(%arg0: i32) -> (i32, i32) {
    %c0_i32 = arith.constant 0 : i32
    %c0_i32_0 = arith.constant 0 : i32
    %c0_i32_1 = arith.constant 0 : i32
    return %c0_i32, %c0_i32_0 : i32, i32
  }
  func.func @transform_2(%arg0: i32) -> (i32, i32) {
    %c0_i32 = arith.constant 0 : i32
    %c0_i32_0 = arith.constant 0 : i32
    %c0_i32_1 = arith.constant 0 : i32
    return %c0_i32, %c0_i32_0 : i32, i32
  }
  func.func @transform_3(%arg0: i32) -> (i32, i32) {
    %c0_i32 = arith.constant 0 : i32
    %c0_i32_0 = arith.constant 0 : i32
    return %c0_i32, %arg0 : i32, i32
  }
  func.func @transform_4(%arg0: i32) -> (i32, i32) {
    %c0_i32 = arith.constant 0 : i32
    %c0_i32_0 = arith.constant 0 : i32
    return %c0_i32, %arg0 : i32, i32
  }
  func.func @transform_5(%arg0: i32) -> (i32, i32, i32) {
    %c0_i32 = arith.constant 0 : i32
    %c0_i32_0 = arith.constant 0 : i32
    %c0_i32_1 = arith.constant 0 : i32
    return %arg0, %c0_i32, %c0_i32_0 : i32, i32, i32
  }
}

</mosaic_0001>

<bundles_post_ra>
// kernel: ema_quantizer_forward.1
= control target key start
LH: loop header
LB: loop body
LE: loop exit
PB: predicated region body
PF: predicated region fallthrough
CT: control target
= control target key end

     0   :  { %s1162_s18 = smov 0   ;;  %s1402_s0 = inlined_call_operand.vmem [shape: f32[8,256], index: 0, kind: input, shape index: {}]   ;;  %s1403_s1 = inlined_call_operand.vmem [shape: f32[64,5], index: 1, kind: input, shape index: {}]   ;;  %s1404_s2 = inlined_call_operand.vmem [shape: f32[4,64], index: 2, kind: input, shape index: {}]   ;;  %s1405_s3 = inlined_call_operand.vmem [shape: f32[8,256], index: 3, kind: output, shape index: {0}]   ;;  %s1406_s4 = inlined_call_operand.vmem [shape: s32[2,256], index: 4, kind: output, shape index: {1}]   ;;  %s1407_s5 = inlined_call_operand.vmem [shape: f32[2,1,128], index: 5, kind: output, shape index: {2}]  }
   0x1 LB: > { %s942_s19 = sadd.s32 4294967295, %s1127_s18   ;;  %p946_p0 = scmp.ge.s32.totalorder %s1127_s18, 1  ;;  %s1127_s18 = sphi %s1162_s18, %s16_s18  }
   0x2   : > { %p191_p1 = scmp.lt.s32.totalorder %s1127_s18, 3 }
   0x4   : > { %p192_p2 = pnand %p946_p0, %p191_p1 }
   0x5   : > { %p224_p3 = scmp.lt.s32.totalorder (!%p192_p2), %s942_s19, 1 }
   0x6   : > { %195 = sbr.rel (%p192_p2) target bundleno = 707 (0x2c3), region = 32 }
   0xb   : > { %v239_v0 = vld [vmem:[%s1403_s1] sm:$0xff]  ;;  %vm251_vm0 = vcmask 39936   ;;  %s1409_s19 = smov (!%p224_p3, %s942_s19), 1  ;;  %vm249_vm1 = vcmask 1043456   ;;  %vm276_vm2 = vcmask 1044480   ;;  %v240_v4 = vld [vmem:[%s1403_s1 + $0x8] sm:$0xff]  ;;  %v398_v32 = vlaneseq }
   0xc   : > { %1042 = vmatprep.mubr.msk.f32.mxu0 %vm251_vm0, %v239_v0  ;;  %s947_s22 = sshll.u32 %s1409_s19, 3  ;;  %v241_v6 = vld [vmem:[%s1403_s1 + $0x10] sm:$0xff]  ;;  %v242_v7 = vld [vmem:[%s1403_s1 + $0x18] sm:$0xff]  ;;  %v243_v8 = vld [vmem:[%s1403_s1 + $0x20] sm:$0xff]  ;;  %v1129_v12 = vmov 0.0   ;;  %vm1130_vm3 = vmmov 0   ;;  %s238_s30 = scalar_lea.vmem %s1407_s5, %s1409_s19 }
   0xd   : > { %s227_s25 = scalar_lea.vmem %s1402_s0, %s947_s22  ;;  %v244_v9 = vld [vmem:[%s1403_s1 + $0x28] sm:$0xff]  ;;  %v245_v10 = vld [vmem:[%s1403_s1 + $0x30] sm:$0xff]  ;;  %v246_v11 = vld [vmem:[%s1403_s1 + $0x38] sm:$0xff]  ;;  %1054 = vmatprep.subr.mxu1 %v1129_v12  ;;  %1070 = vmatprep.mubr.msk.f32.mxu1 %vm1130_vm3, %v1129_v12  ;;  %v1239_v37 = vshrl.u32 %v398_v32, 7  ;;  %s949_s15 = sshll.u32 %s1409_s19, 1 }
   0xe   : > { %v1182_v1 = vld [vmem:[%s227_s25] sm:$0xf]  ;;  %v1184_v2 = vld [vmem:[%s227_s25 + $0x4] sm:$0xf]  ;;  %s235_s20 = scalar_lea.vmem %s1406_s4, %s949_s15  ;;  %s231_s26 = scalar_lea.vmem %s1405_s3, %s947_s22 }
   0xf   : > { %v250_v3 = vsel %vm249_vm1, %v1182_v1, 1.0  ;;  %v560_v5 = vsel %vm249_vm1, %v1184_v2, 1.0  ;;  %v1248_v43 = vadd.s32 16, %v1239_v37  ;;  %v1251_v44 = vadd.s32 48, %v1239_v37 }
  0x10   : > { %1040 = vmatprep.subr.msk.mxu0 %vm276_vm2, %v250_v3  ;;  %v400_v46 = vadd.s32 8, %v1239_v37  ;;  %v402_v50 = vadd.s32 24, %v1239_v37  ;;  %v403_v53 = vadd.s32 32, %v1239_v37  ;;  %v404_v54 = vadd.s32 40, %v1239_v37 }
  0x11   : > { %1041 = vmatpush3.msk.msra.mxu0 %vm276_vm2, %v250_v3  ;;  %v406_v55 = vadd.s32 56, %v1239_v37 }
  0x12   : > { %1043 = vmatmul.mubr.msk.f32.vlgmr.msra.gmra.mxu0 %vm251_vm0, %v240_v4  ;;  %1073 = vmatprep.subr.msk.mxu0 %vm276_vm2, %v560_v5 }
  0x13   : > { %1074 = vmatpush3.msk.msra.mxu0 %vm276_vm2, %v560_v5  ;;  %1045 = vmatprep.mubr.msk.f32.mxu0 %vm251_vm0, %v241_v6 }
  0x16   : > { %1046 = vmatmul.mubr.msk.f32.gmra.mxu0 %vm251_vm0, %v242_v7 }
  0x17   : > { %1048 = vmatprep.mubr.msk.f32.mxu0 %vm251_vm0, %v243_v8 }
  0x1a   : > { %1049 = vmatmul.mubr.msk.f32.gmra.mxu0 %vm251_vm0, %v244_v9 }
  0x1b   : > { %1051 = vmatprep.mubr.msk.f32.mxu0 %vm251_vm0, %v245_v10 }
  0x1e   : > { %1052 = vmatmul.mubr.msk.f32.gmra.mxu0 %vm251_vm0, %v246_v11 }
  0x1f   : > { %1075 = vmatprep.mubr.msk.f32.mxu0 %vm251_vm0, %v239_v0 }
  0x22   : > { %1076 = vmatmul.mubr.msk.f32.vlgmr.msra.gmra.mxu0 %vm251_vm0, %v240_v4 }
  0x23   : > { %1078 = vmatprep.mubr.msk.f32.mxu0 %vm251_vm0, %v241_v6 }
  0x26   : > { %1079 = vmatmul.mubr.msk.f32.gmra.mxu0 %vm251_vm0, %v242_v7 }
  0x27   : > { %1081 = vmatprep.mubr.msk.f32.mxu0 %vm251_vm0, %v243_v8 }
  0x2a   : > { %1082 = vmatmul.mubr.msk.f32.gmra.mxu0 %vm251_vm0, %v244_v9 }
  0x2b   : > { %1084 = vmatprep.mubr.msk.f32.mxu0 %vm251_vm0, %v245_v10 }
  0x2e   : > { %1085 = vmatmul.mubr.msk.f32.gmra.mxu0 %vm251_vm0, %v246_v11 }
  0xd2   : > { %v1044_v13 = vpop.f32.mrf.mxu0 }
  0xd4   : > { %v346_v14 = vpop.f32.mrf.mxu0 }
  0xd6   : > { %v1047_v15 = vpop.f32.mrf.mxu0 }
  0xd8   : > { %v356_v16 = vpop.f32.mrf.mxu0 }
  0xda   : > { %v1050_v17 = vpop.f32.mrf.mxu0 }
  0xdb   : > { %v386_v22 = vmin.f32 %v1044_v13, %v1050_v17 }
  0xdc   : > { %v366_v18 = vpop.f32.mrf.mxu0 }
  0xdd   : > { %v385_v20 = vmin.f32 %v346_v14, %v366_v18 }
  0xde   : > { %v1053_v19 = vpop.f32.mrf.mxu0 }
  0xdf   : > { %v388_v23 = vmin.f32 %v1047_v15, %v1053_v19  ;;  %v389_v26 = vmin.f32 %v385_v20, %v386_v22 }
  0xe0   : > { %v376_v21 = vpop.f32.mrf.mxu0 }
  0xe1   : > { %v387_v24 = vmin.f32 %v356_v16, %v376_v21 }
  0xe2   : > { %v1229_v25 = vpop.f32.mrf.mxu0 }
  0xe3   : > { %v390_v27 = vmin.f32 %v387_v24, %v388_v23 }
  0xe4   : > { %v1231_v28 = vpop.f32.mrf.mxu0 }
  0xe5   : > { %v391_v29 = vmin.f32 %v389_v26, %v390_v27 }
  0xe6   : > { %v1233_v30 = vpop.f32.mrf.mxu0 }
  0xe7   : > { %v392_v31 = vrot.slane %v391_v29, 4 }
  0xe8   : > { %v1235_v33 = vpop.f32.mrf.mxu0 }
  0xe9   : > { %v393_v34 = vmin.f32 %v391_v29, %v392_v31 }
  0xea   : > { %v1237_v35 = vpop.f32.mrf.mxu0 }
  0xeb   : > { %v394_v36 = vrot.slane %v393_v34, 2  ;;  %v670_v45 = vmin.f32 %v1229_v25, %v1237_v35 }
  0xec   : > { %v1241_v38 = vpop.f32.mrf.mxu0 }
  0xed   : > { %v395_v39 = vmin.f32 %v393_v34, %v394_v36  ;;  %v669_v40 = vmin.f32 %v1231_v28, %v1241_v38 }
  0xee   : > { %v1245_v41 = vpop.f32.mrf.mxu0 }
  0xef   : > { %v396_v42 = vrot.slane %v395_v39, 1  ;;  %v672_v49 = vmin.f32 %v1233_v30, %v1245_v41  ;;  %v673_v52 = vmin.f32 %v669_v40, %v670_v45 }
  0xf0   : > { %v1256_v47 = vpop.f32.mrf.mxu0 }
  0xf1   : > { %v397_v48 = vmin.f32 %v395_v39, %v396_v42  ;;  %v671_v51 = vmin.f32 %v1235_v33, %v1256_v47  ;;  %v1131_v42 = vmov 1.0  }
  0xf3   : > { %vm409_vm4 = vcmp.eq.f32.partialorder %v356_v16, %v397_v48  ;;  %vm413_vm5 = vcmp.eq.f32.partialorder %v376_v21, %v397_v48  ;;  %v674_v56 = vmin.f32 %v671_v51, %v672_v49  ;;  %vm407_vm6 = vcmp.eq.f32.partialorder %v346_v14, %v397_v48 }
  0xf4   : > { %v1267_v57 = vsel %vm409_vm4, %v1248_v43, 64  ;;  %v1270_v58 = vsel %vm413_vm5, %v1251_v44, 64  ;;  %vm408_vm7 = vcmp.eq.f32.partialorder %v1044_v13, %v397_v48  ;;  %vm410_vm8 = vcmp.eq.f32.partialorder %v1047_v15, %v397_v48 }
  0xf5   : > { %vm427_vm9 = vcmp.lt.s32.totalorder %v1267_v57, %v1270_v58  ;;  %v675_v59 = vmin.f32 %v673_v52, %v674_v56  ;;  %vm411_vm10 = vcmp.eq.f32.partialorder %v366_v18, %v397_v48  ;;  %vm412_vm11 = vcmp.eq.f32.partialorder %v1050_v17, %v397_v48 }
  0xf6   : > { %vm414_vm12 = vcmp.eq.f32.partialorder %v1053_v19, %v397_v48  ;;  %v1275_v60 = vsel %vm407_vm6, %v1239_v37, 64  ;;  %v1277_v61 = vsel %vm408_vm7, %v400_v46, 64  ;;  %v1279_v63 = vsel %vm410_vm8, %v402_v50, 64 }
  0xf7   : > { %v676_v62 = vrot.slane %v675_v59, 4  ;;  %v1281_v0 = vsel %vm411_vm10, %v403_v53, 64  ;;  %v1283_v3 = vsel %vm412_vm11, %v404_v54, 64  ;;  %v428_v4 = vsel %vm427_vm9, %v1267_v57, %v1270_v58 }
  0xf8   : > { %v1287_v5 = vsel %vm414_vm12, %v406_v55, 64  ;;  %vm423_vm13 = vcmp.lt.s32.totalorder %v1275_v60, %v1281_v0  ;;  %vm425_vm14 = vcmp.lt.s32.totalorder %v1277_v61, %v1283_v3 }
  0xf9   : > { %v677_v6 = vmin.f32 %v675_v59, %v676_v62  ;;  %v424_v7 = vsel %vm423_vm13, %v1275_v60, %v1281_v0  ;;  %v426_v8 = vsel %vm425_vm14, %v1277_v61, %v1283_v3  ;;  %vm429_vm15 = vcmp.lt.s32.totalorder %v1279_v63, %v1287_v5 }
  0xfa   : > { %v430_v9 = vsel %vm429_vm15, %v1279_v63, %v1287_v5  ;;  %vm431_vm0 = vcmp.lt.s32.totalorder %v424_v7, %v426_v8 }
  0xfb   : > { %v678_v10 = vrot.slane %v677_v6, 2  ;;  %v432_v11 = vsel %vm431_vm0, %v424_v7, %v426_v8  ;;  %vm433_vm2 = vcmp.lt.s32.totalorder %v428_v4, %v430_v9 }
  0xfc   : > { %v434_v13 = vsel %vm433_vm2, %v428_v4, %v430_v9 }
  0xfd   : > { %v679_v14 = vmin.f32 %v677_v6, %v678_v10  ;;  %vm435_vm4 = vcmp.lt.s32.totalorder %v432_v11, %v434_v13 }
  0xfe   : > { %v436_v15 = vsel %vm435_vm4, %v432_v11, %v434_v13 }
  0xff   : > { %v680_v16 = vrot.slane %v679_v14, 1  ;;  %v437_v17 = vrot.slane %v436_v15, 4 }
 0x101   : > { %v681_v18 = vmin.f32 %v679_v14, %v680_v16  ;;  %vm438_vm5 = vcmp.lt.s32.totalorder %v436_v15, %v437_v17 }
 0x102   : > { %v439_v19 = vsel %vm438_vm5, %v436_v15, %v437_v17 }
 0x103   : > { %vm682_vm6 = vcmp.eq.f32.partialorder %v1231_v28, %v681_v18  ;;  %vm683_vm7 = vcmp.eq.f32.partialorder %v1229_v25, %v681_v18  ;;  %vm684_vm8 = vcmp.eq.f32.partialorder %v1235_v33, %v681_v18  ;;  %vm685_vm9 = vcmp.eq.f32.partialorder %v1233_v30, %v681_v18 }
 0x104   : > { %vm686_vm10 = vcmp.eq.f32.partialorder %v1241_v38, %v681_v18  ;;  %vm687_vm11 = vcmp.eq.f32.partialorder %v1237_v35, %v681_v18  ;;  %vm688_vm12 = vcmp.eq.f32.partialorder %v1256_v47, %v681_v18  ;;  %vm689_vm13 = vcmp.eq.f32.partialorder %v1245_v41, %v681_v18 }
 0x105   : > { %v1310_v20 = vsel %vm682_vm6, %v1239_v37, 64  ;;  %v1312_v21 = vsel %vm683_vm7, %v400_v46, 64  ;;  %v1315_v22 = vsel %vm684_vm8, %v1248_v43, 64  ;;  %v1317_v23 = vsel %vm685_vm9, %v402_v50, 64  ;;  %v247_v46 = vld [vmem:[%s1404_s2] sm:$0xf] }
 0x106   : > { %v1319_v24 = vsel %vm686_vm10, %v403_v53, 64  ;;  %v1321_v25 = vsel %vm687_vm11, %v404_v54, 64  ;;  %v1324_v26 = vsel %vm688_vm12, %v1251_v44, 64  ;;  %v1326_v27 = vsel %vm689_vm13, %v406_v55, 64 }
 0x107   : > { %vm698_vm14 = vcmp.lt.s32.totalorder %v1310_v20, %v1319_v24  ;;  %vm700_vm15 = vcmp.lt.s32.totalorder %v1312_v21, %v1321_v25  ;;  %vm702_vm0 = vcmp.lt.s32.totalorder %v1315_v22, %v1324_v26  ;;  %vm704_vm2 = vcmp.lt.s32.totalorder %v1317_v23, %v1326_v27 }
 0x108   : > { %v699_v28 = vsel %vm698_vm14, %v1310_v20, %v1319_v24  ;;  %v701_v29 = vsel %vm700_vm15, %v1312_v21, %v1321_v25  ;;  %v703_v30 = vsel %vm702_vm0, %v1315_v22, %v1324_v26  ;;  %v705_v31 = vsel %vm704_vm2, %v1317_v23, %v1326_v27 }
 0x109   : > { %vm706_vm4 = vcmp.lt.s32.totalorder %v699_v28, %v701_v29  ;;  %vm708_vm5 = vcmp.lt.s32.totalorder %v703_v30, %v705_v31  ;;  %v440_v32 = vrot.slane %v439_v19, 2 }
 0x10a   : > { %v707_v33 = vsel %vm706_vm4, %v699_v28, %v701_v29  ;;  %v709_v34 = vsel %vm708_vm5, %v703_v30, %v705_v31  ;;  %vm470_vm5 = vcmask 523264  }
 0x10b   : > { %vm710_vm6 = vcmp.lt.s32.totalorder %v707_v33, %v709_v34  ;;  %vm441_vm7 = vcmp.lt.s32.totalorder %v439_v19, %v440_v32 }
 0x10c   : > { %v711_v35 = vsel %vm710_vm6, %v707_v33, %v709_v34  ;;  %v442_v36 = vsel %vm441_vm7, %v439_v19, %v440_v32 }
 0x10d   : > { %v712_v37 = vrot.slane %v711_v35, 4  ;;  %v443_v38 = vrot.slane %v442_v36, 1 }
 0x10f   : > { %vm713_vm8 = vcmp.lt.s32.totalorder %v711_v35, %v712_v37  ;;  %vm444_vm9 = vcmp.lt.s32.totalorder %v442_v36, %v443_v38 }
 0x110   : > { %v714_v39 = vsel %vm713_vm8, %v711_v35, %v712_v37  ;;  %v445_v40 = vsel %vm444_vm9, %v442_v36, %v443_v38 }
 0x111   : > { %v715_v41 = vrot.slane %v714_v39, 2  ;;  %vm453_vm10 = vcmp.eq.s32.totalorder %v1287_v5, %v445_v40  ;;  %545 = vst [vmem:[%s235_s20] sm:$0x1] %v445_v40  ;;  %vm452_vm12 = vcmp.eq.s32.totalorder %v1270_v58, %v445_v40  ;;  %vm451_vm13 = vcmp.eq.s32.totalorder %v1283_v3, %v445_v40 }
 0x112   : > { %1055 = vmatpush3.msk.msra.mxu1 %vm453_vm10, %v1131_v42  ;;  %vm450_vm15 = vcmp.eq.s32.totalorder %v1281_v0, %v445_v40  ;;  %vm449_vm0 = vcmp.eq.s32.totalorder %v1279_v63, %v445_v40  ;;  %vm448_vm2 = vcmp.eq.s32.totalorder %v1267_v57, %v445_v40  ;;  %vm447_vm4 = vcmp.eq.s32.totalorder %v1277_v61, %v445_v40 }
 0x113   : > { %vm716_vm11 = vcmp.lt.s32.totalorder %v714_v39, %v715_v41  ;;  %1056 = vmatprep.subr.mxu1 %v1129_v12  ;;  %vm446_vm6 = vcmp.eq.s32.totalorder %v1275_v60, %v445_v40 }
 0x114   : > { %v717_v43 = vsel %vm716_vm11, %v714_v39, %v715_v41  ;;  %1057 = vmatpush3.msk.msra.mxu1 %vm452_vm12, %v1131_v42 }
 0x115   : > { %v718_v44 = vrot.slane %v717_v43, 1  ;;  %1058 = vmatprep.subr.mxu1 %v1129_v12 }
 0x116   : > { %1059 = vmatpush3.msk.msra.mxu1 %vm451_vm13, %v1131_v42 }
 0x117   : > { %vm719_vm14 = vcmp.lt.s32.totalorder %v717_v43, %v718_v44  ;;  %1060 = vmatprep.subr.mxu1 %v1129_v12 }
 0x118   : > { %v720_v45 = vsel %vm719_vm14, %v717_v43, %v718_v44  ;;  %1061 = vmatpush3.msk.msra.mxu1 %vm450_vm15, %v1131_v42 }
 0x119   : > { %816 = vst [vmem:[%s235_s20 + $0x1] sm:$0x1] %v720_v45  ;;  %1062 = vmatprep.subr.mxu1 %v1129_v12  ;;  %vm728_vm7 = vcmp.eq.s32.totalorder %v1326_v27, %v720_v45  ;;  %vm727_vm8 = vcmp.eq.s32.totalorder %v1324_v26, %v720_v45  ;;  %vm726_vm9 = vcmp.eq.s32.totalorder %v1321_v25, %v720_v45 }
 0x11a   : > { %1063 = vmatpush3.msk.msra.mxu1 %vm449_vm0, %v1131_v42  ;;  %vm725_vm10 = vcmp.eq.s32.totalorder %v1319_v24, %v720_v45  ;;  %vm723_vm11 = vcmp.eq.s32.totalorder %v1315_v22, %v720_v45  ;;  %vm722_vm12 = vcmp.eq.s32.totalorder %v1312_v21, %v720_v45  ;;  %vm721_vm13 = vcmp.eq.s32.totalorder %v1310_v20, %v720_v45 }
 0x11b   : > { %1064 = vmatprep.subr.mxu1 %v1129_v12 }
 0x11c   : > { %1065 = vmatpush3.msk.msra.mxu1 %vm448_vm2, %v1131_v42 }
 0x11d   : > { %1066 = vmatprep.subr.mxu1 %v1129_v12 }
 0x11e   : > { %1067 = vmatpush3.msk.msra.mxu1 %vm447_vm4, %v1131_v42 }
 0x11f   : > { %1068 = vmatprep.subr.mxu1 %v1129_v12 }
 0x120   : > { %1069 = vmatpush3.msk.msra.mxu1 %vm446_vm6, %v1131_v42 }
 0x121   : > { %1071 = vmatmul.mubr.msk.f32.vlgmr.msra.gmra.mxu1 %vm470_vm5, %v247_v46  ;;  %1087 = vmatprep.subr.mxu1 %v1129_v12 }
 0x122   : > { %1088 = vmatpush3.msk.msra.mxu1 %vm728_vm7, %v1131_v42  ;;  %1103 = vmatprep.mubr.msk.f32.mxu1 %vm1130_vm3, %v1129_v12  ;;  %vm724_vm3 = vcmp.eq.s32.totalorder %v1317_v23, %v720_v45 }
 0x123   : > { %1089 = vmatprep.subr.mxu1 %v1129_v12 }
 0x124   : > { %1090 = vmatpush3.msk.msra.mxu1 %vm727_vm8, %v1131_v42 }
 0x125   : > { %1091 = vmatprep.subr.mxu1 %v1129_v12 }
 0x126   : > { %1092 = vmatpush3.msk.msra.mxu1 %vm726_vm9, %v1131_v42 }
 0x127   : > { %1093 = vmatprep.subr.mxu1 %v1129_v12 }
 0x128   : > { %1094 = vmatpush3.msk.msra.mxu1 %vm725_vm10, %v1131_v42 }
 0x129   : > { %1095 = vmatprep.subr.mxu1 %v1129_v12 }
 0x12a   : > { %1096 = vmatpush3.msk.msra.mxu1 %vm724_vm3, %v1131_v42 }
 0x12b   : > { %1097 = vmatprep.subr.mxu1 %v1129_v12 }
 0x12c   : > { %1098 = vmatpush3.msk.msra.mxu1 %vm723_vm11, %v1131_v42 }
 0x12d   : > { %1099 = vmatprep.subr.mxu1 %v1129_v12 }
 0x12e   : > { %1100 = vmatpush3.msk.msra.mxu1 %vm722_vm12, %v1131_v42 }
 0x12f   : > { %1101 = vmatprep.subr.mxu1 %v1129_v12 }
 0x130   : > { %1102 = vmatpush3.msk.msra.mxu1 %vm721_vm13, %v1131_v42 }
 0x131   : > { %1104 = vmatmul.mubr.msk.f32.vlgmr.msra.gmra.mxu1 %vm470_vm5, %v247_v46 }
 0x1e1   : > { %v540_v47 = vpop.f32.mrf.mxu1 }
 0x1e2   : > { %544 = vst [vmem:[%s231_s26] sm:$0xf] %v540_v47  ;;  %v546_v48 = vsub.f32 %v540_v47, %v1182_v1 }
 0x1e3   : > { %v1072_v49 = vpop.f32.mrf.mxu1 }
 0x1e4   : > { %v547_v50 = vmul.f32 %v546_v48, %v546_v48 }
 0x1e6   : > { %v548_v51 = vsel %vm249_vm1, %v547_v50, 0.0 }
 0x1e7   : > { %549 = vadd.xlane.f32.xlu0 %v548_v51 }
 0x1f1   : > { %v811_v12 = vpop.f32.mrf.mxu1 }
 0x1f2   : > { %815 = vst [vmem:[%s231_s26 + $0x4] sm:$0xf] %v811_v12  ;;  %v817_v52 = vsub.f32 %v811_v12, %v1184_v2 }
 0x1f3   : > { %v1105_v53 = vpop.f32.mrf.mxu1 }
 0x1f4   : > { %v818_v54 = vmul.f32 %v817_v52, %v817_v52 }
 0x1f6   : > { %v819_v55 = vsel %vm249_vm1, %v818_v54, 0.0 }
 0x1f7   : > { %820 = vadd.xlane.f32.xlu0 %v819_v55 }
 0x270   : > { %v550_v56 = vpop.xlane.xlu0 %549 }
 0x271   : > { %v551_v57 = vrot.slane %v550_v56, 4 }
 0x273   : > { %v552_v58 = vadd.f32 %v551_v57, %v550_v56 }
 0x275   : > { %v553_v59 = vrot.slane %v552_v58, 2 }
 0x277   : > { %v554_v1 = vadd.f32 %v553_v59, %v552_v58 }
 0x279   : > { %v555_v60 = vrot.slane %v554_v1, 1 }
 0x27b   : > { %v556_v61 = vadd.f32 %v555_v60, %v554_v1 }
 0x27d   : > { %1106 = vpush %v556_v61 }
 0x280   : > { %v821_v62 = vpop.xlane.xlu0 %820 }
 0x281   : > { %v822_v63 = vrot.slane %v821_v62, 4 }
 0x283   : > { %v823_v0 = vadd.f32 %v822_v63, %v821_v62 }
 0x285   : > { %v824_v3 = vrot.slane %v823_v0, 2 }
 0x287   : > { %v825_v4 = vadd.f32 %v824_v3, %v823_v0 }
 0x289   : > { %v826_v2 = vrot.slane %v825_v4, 1 }
 0x28b   : > { %v827_v5 = vadd.f32 %v826_v2, %v825_v4 }
 0x28d   : > { %1108 = vpush %v827_v5 }
 0x2ae   : > { %s1107_s22 = spop %1106 }
 0x2be   : > { %s1109_s27 = spop %1108 }
 0x2bf   : > { %s829_s6 = sadd.f32 %s1109_s27, %s1107_s22 }
 0x2c1   : > { %v830_v6 = vstv %s829_s6 }
 0x2c2   : > { %832 = vst [vmem:[%s238_s30] sm:$0x1] %v830_v6 }
 0x2c3 PF: > { %s16_s18 = sadd.s32 1, %s1127_s18  }
 0x2c4   : > { %p13_p4 = scmp.ge.s32.totalorder %s16_s18, 4  }
 0x2c6   :  { %15 = sbr.rel (!%p13_p4) target bundleno = 1 (0x1), region = 86 }

</bundles_post_ra>
